<compile_context>
chip_gen: v7x
topology: tpu7x:2x2x1
jax: 0.10.0
libtpu: 0.0.40
codegen_flags: <defaults>
</compile_context>

<pallas_src>
import jax
import jax.numpy as jnp
from jax.experimental import pallas as pl
from jax.experimental.pallas import tpu as pltpu


def _logreg_kernel(x_ref, w_ref, b_ref, o_ref):
    # x_ref: (TB, D) native dtype, w_ref: (1, D), b_ref: (1, 1) f32, o_ref: (TB, 1) f32
    tb, d = x_ref.shape
    d_chunk = 512 if d >= 512 else d           # <= 4 lane-groups live at a time
    nfull = d // d_chunk
    rem = d - nfull * d_chunk

    # Chunked accumulate: acc stays (TB, d_chunk) f32 — no (TB, D) intermediate.
    acc = jnp.zeros((tb, d_chunk), jnp.float32)
    for c in range(nfull):                      # static trip count (D is static)
        lo = c * d_chunk
        xc = x_ref[:, lo:lo + d_chunk].astype(jnp.float32)
        wc = w_ref[:, lo:lo + d_chunk].astype(jnp.float32)
        acc = acc + xc * wc                     # VPU broadcast multiply-add

    logits = jnp.sum(acc, axis=-1, keepdims=True)   # XLU lane reduction -> (TB, 1)

    if rem:                                     # ragged tail of D (static slice)
        lo = nfull * d_chunk
        xt = x_ref[:, lo:].astype(jnp.float32)
        wt = w_ref[:, lo:].astype(jnp.float32)
        logits = logits + jnp.sum(xt * wt, axis=-1, keepdims=True)

    logits = logits + b_ref[...].astype(jnp.float32)    # (1,1) broadcast
    o_ref[...] = jax.nn.sigmoid(logits).astype(o_ref.dtype)


def _vmem_budgets():
    """(per-x-block byte budget, scoped vmem limit) — generation aware."""
    try:
        cap = pltpu.get_tpu_info().vmem_capacity_bytes
    except Exception:
        cap = 128 << 20
    if cap <= (64 << 20):                 # v7x-class: 64 MiB per TensorCore
        return 8 << 20, 40 << 20          # 2 x 8 MiB x-buffers + headroom < 40 MiB
    return 16 << 20, 64 << 20             # v5e / v6e: 128 MiB physical VMEM


def _pick_batch_tile(batch, dim, itemsize, block_budget_bytes):
    """Largest batch tile (multiple of 8) whose x block fits the byte budget."""
    bytes_per_row = max(1, dim * itemsize)
    tb = (block_budget_bytes // bytes_per_row) // 8 * 8
    tb = max(8, tb)
    if tb >= batch:
        return batch                      # block == full array dim is always legal
    return tb


def logistic_regression(x, weight, bias, *, vmem_limit_bytes=None):
    """Pallas equivalent of torch.sigmoid(nn.Linear(input_dim, 1)(x)).

    Args:
      x:      (B, D) float32 or bfloat16 (kept in native dtype; upcast in-kernel)
      weight: (1, D) (PyTorch nn.Linear weight layout)
      bias:   (1,)
    Returns:
      (B, 1) float32
    """
    B, D = x.shape
    w2 = weight.reshape(1, D)                       # no transpose needed
    b2 = bias.reshape(1, 1).astype(jnp.float32)

    block_budget, auto_limit = _vmem_budgets()
    if vmem_limit_bytes is None:
        vmem_limit_bytes = auto_limit

    tb = _pick_batch_tile(B, D, jnp.dtype(x.dtype).itemsize, block_budget)
    grid = (pl.cdiv(B, tb),)

    cost = pl.CostEstimate(
        flops=2 * B * D,
        transcendentals=B,                          # one exp per sigmoid
        bytes_accessed=B * D * jnp.dtype(x.dtype).itemsize
                       + D * jnp.dtype(w2.dtype).itemsize + 4 + 4 * B,
    )

    return pl.pallas_call(
        _logreg_kernel,
        out_shape=jax.ShapeDtypeStruct((B, 1), jnp.float32),
        grid_spec=pl.GridSpec(
            grid=grid,
            in_specs=[
                pl.BlockSpec((tb, D), lambda i: (i, 0)),   # streamed batch tiles
                pl.BlockSpec((1, D), lambda i: (0, 0)),    # weight: resident
                pl.BlockSpec((1, 1), lambda i: (0, 0)),    # bias:   resident
            ],
            out_specs=pl.BlockSpec((tb, 1), lambda i: (i, 0)),
        ),
        compiler_params=pltpu.CompilerParams(
            dimension_semantics=("parallel",),      # megacore split on v7x
            vmem_limit_bytes=vmem_limit_bytes,      # lift v5e's 16 MiB scoped default
        ),
        cost_estimate=cost,
    )(x, w2, b2)


if __name__ == "__main__":
    key = jax.random.PRNGKey(0)
    kx, kw, kb = jax.random.split(key, 3)

    batch, input_dim = 16, 128                      # small, lane-dense demo shape
    x = jax.random.normal(kx, (batch, input_dim), dtype=jnp.float32)

    # Deterministic params (mimic nn.Linear's uniform(-1/sqrt(D), 1/sqrt(D)) init).
    bound = 1.0 / jnp.sqrt(jnp.float32(input_dim))
    weight = jax.random.uniform(kw, (1, input_dim), dtype=jnp.float32,
                                minval=-bound, maxval=bound)
    bias = jax.random.uniform(kb, (1,), dtype=jnp.float32,
                              minval=-bound, maxval=bound)

    # f32 path
    out = jax.block_until_ready(logistic_regression(x, weight, bias))
    ref = jax.nn.sigmoid(x @ weight.T + bias)
    assert out.shape == (batch, 1), out.shape
    assert jnp.allclose(out, ref, atol=1e-5, rtol=1e-5), "f32 mismatch vs reference"

    # bf16 input path (native-dtype streaming, in-kernel upcast)
    x_bf16 = x.astype(jnp.bfloat16)
    out_bf = jax.block_until_ready(logistic_regression(x_bf16, weight, bias))
    ref_bf = jax.nn.sigmoid(x_bf16.astype(jnp.float32) @ weight.T + bias)
    assert jnp.allclose(out_bf, ref_bf, atol=1e-5, rtol=1e-5), "bf16 mismatch vs reference"

    print("KERNEL_OK")
</pallas_src>

<mosaic_0001>
module attributes {stable_mosaic.version = 11 : i64} {
  func.func @_logreg_kernel(%arg0: i32, %arg1: memref<16x128xf32, #tpu.memory_space<vmem>>, %arg2: memref<1x128xf32, #tpu.memory_space<vmem>>, %arg3: memref<1x1xf32, #tpu.memory_space<vmem>>, %arg4: memref<16x1xf32, #tpu.memory_space<vmem>>) attributes {dimension_semantics = [#tpu.dimension_semantics<parallel>], iteration_bounds = array<i64: 1>, scalar_prefetch = 0 : i64, scratch_operands = 0 : i64, tpu.core_type = #tpu.core_type<tc>, window_params = [{transform_indices = @transform_0, window_bounds = array<i64: 16, 128>}, {pipeline_mode = #tpu.pipeline_mode<synchronous>, transform_indices = @transform_1, window_bounds = array<i64: 1, 128>}, {pipeline_mode = #tpu.pipeline_mode<synchronous>, transform_indices = @transform_2, window_bounds = array<i64: 1, 1>}, {transform_indices = @transform_3, window_bounds = array<i64: 16, 1>}]} {
    %cst = arith.constant 0.000000e+00 : f32
    %0 = vector.broadcast %cst : f32 to vector<16x128xf32>
    %c0 = arith.constant 0 : index
    %c0_0 = arith.constant 0 : index
    %1 = vector.load %arg1[%c0, %c0_0] : memref<16x128xf32, #tpu.memory_space<vmem>>, vector<16x128xf32>
    %c0_1 = arith.constant 0 : index
    %c0_2 = arith.constant 0 : index
    %2 = vector.load %arg2[%c0_1, %c0_2] : memref<1x128xf32, #tpu.memory_space<vmem>>, vector<1x128xf32>
    %3 = vector.broadcast %2 : vector<1x128xf32> to vector<16x128xf32>
    %4 = arith.mulf %1, %3 : vector<16x128xf32>
    %5 = arith.addf %0, %4 : vector<16x128xf32>
    %cst_3 = arith.constant dense<0.000000e+00> : vector<16xf32>
    %6 = vector.multi_reduction <add>, %5, %cst_3 [1] : vector<16x128xf32> to vector<16xf32>
    %7 = vector.shape_cast %6 : vector<16xf32> to vector<16x1xf32>
    %c0_4 = arith.constant 0 : index
    %c0_5 = arith.constant 0 : index
    %8 = vector.load %arg3[%c0_4, %c0_5] : memref<1x1xf32, #tpu.memory_space<vmem>>, vector<1x1xf32>
    %9 = vector.broadcast %8 : vector<1x1xf32> to vector<16x1xf32>
    %10 = arith.addf %7, %9 : vector<16x1xf32>
    %11 = arith.negf %10 : vector<16x1xf32>
    %12 = math.exp %11 : vector<16x1xf32>
    %cst_6 = arith.constant 1.000000e+00 : f32
    %13 = vector.broadcast %cst_6 : f32 to vector<16x1xf32>
    %14 = arith.addf %13, %12 : vector<16x1xf32>
    %15 = arith.divf %13, %14 : vector<16x1xf32>
    %c0_7 = arith.constant 0 : index
    %c0_8 = arith.constant 0 : index
    %16 = vector.load %arg4[%c0_7, %c0_8] : memref<16x1xf32, #tpu.memory_space<vmem>>, vector<16x1xf32>
    tpu.vector_store %arg4[%c0_7, %c0_8], %15 {strides = array<i32>} : memref<16x1xf32, #tpu.memory_space<vmem>>, vector<16x1xf32>,
    return
  }
  func.func @transform_0(%arg0: i32) -> (i32, i32) {
    %c0_i32 = arith.constant 0 : i32
    %c0_i32_0 = arith.constant 0 : i32
    return %arg0, %c0_i32 : i32, i32
  }
  func.func @transform_1(%arg0: i32) -> (i32, i32) {
    %c0_i32 = arith.constant 0 : i32
    %c0_i32_0 = arith.constant 0 : i32
    %c0_i32_1 = arith.constant 0 : i32
    return %c0_i32, %c0_i32_0 : i32, i32
  }
  func.func @transform_2(%arg0: i32) -> (i32, i32) {
    %c0_i32 = arith.constant 0 : i32
    %c0_i32_0 = arith.constant 0 : i32
    %c0_i32_1 = arith.constant 0 : i32
    return %c0_i32, %c0_i32_0 : i32, i32
  }
  func.func @transform_3(%arg0: i32) -> (i32, i32) {
    %c0_i32 = arith.constant 0 : i32
    %c0_i32_0 = arith.constant 0 : i32
    return %arg0, %c0_i32 : i32, i32
  }
}

</mosaic_0001>

<bundles_post_ra>
// kernel: tpu_custom_call.1
= control target key start
LH: loop header
LB: loop body
LE: loop exit
PB: predicated region body
PF: predicated region fallthrough
CT: control target
= control target key end

     0   :  { %s261_s0 = inlined_call_operand.hbm [shape: f32[16,128], index: 0, kind: input, shape index: {}]   ;;  %s262_s1 = inlined_call_operand.hbm [shape: f32[1,128], index: 1, kind: input, shape index: {}]   ;;  %s263_s2 = inlined_call_operand.<no memory space> [shape: f32[1,1], index: 2, kind: input, shape index: {}]   ;;  %s264_s3 = inlined_call_operand.hbm [shape: f32[16,1], index: 3, kind: output, shape index: {}]  }
   0x1   :  { %v8_v0 = vstv %s263_s2 }
   0x2   :  { %9 = vst [vmem:[#allocation2] sm:$0x1] %v8_v0 }
   0x3   :  { %10 = vsyncpa [#allocation4], 0 }
   0x4   :  { %11 = vsyncpa [#allocation7], 0 }
   0x5   :  { %12 = vsyncpa [#allocation5], 0  ;;  %s191_s14 = smov [#allocation3]   ;;  %s119_s18 = scalar_lea.hbm %s261_s0, 256 }
   0x6   :  { %s18_s15 = sshll.u32 %s191_s14, 4  ;;  %p120_p0 = scmp.ne.s32.totalorder %s261_s0, %s119_s18  ;;  %s19_s15 = int_to_ptr.vmem [resolvable:$true] %s18_s15 }
   0x7   :  { %p123_p1 = scmp.lt.u32.totalorder %s119_s18, %s261_s0 }
   0x9   :  { %p125_p2 = pnand %p123_p1, %p120_p0 }
   0xb   :  { %128 = shalt.err (!%p125_p2)
}
   0xc   :  { %s129_s2 = scalar_lea.vmem %s19_s15, 256  ;;  %p134_p4 = scmp.lt.s32.totalorder %s19_s15, %s19_s15 }
   0xd   :  { %p130_p3 = scmp.ne.s32.totalorder %s19_s15, %s129_s2  ;;  %p135_p5 = scmp.lt.s32.totalorder %s129_s2, %s129_s2 }
   0xf   :  { %p136_p6 = por %p135_p5, %p134_p4 }
  0x11   :  { %p137_p7 = pnand %p136_p6, %p130_p3 }
  0x13   :  { %140 = shalt.err (!%p137_p7)
}
  0x14   :  { %s192_s23 = smov 128   ;;  %s193_s24 = smov 8  }
  0x15   :  { %24 = dma.hbm_to_vmem [thread:$0]  %s261_s0, 256, %s19_s15, [#allocation4], %s192_s23, %s192_s23, %s193_s24  }
  0x16   :  { %s194_s27 = smov [#allocation6]   ;;  %s141_s4 = scalar_lea.hbm %s262_s1, 16 }
  0x17   :  { %s31_s28 = sshll.u32 %s194_s27, 4  ;;  %p142_p8 = scmp.ne.s32.totalorder %s262_s1, %s141_s4  ;;  %s32_s28 = int_to_ptr.vmem [resolvable:$true] %s31_s28 }
  0x18   :  { %p145_p9 = scmp.lt.u32.totalorder %s141_s4, %s262_s1 }
  0x1a   :  { %p147_p10 = pnand %p145_p9, %p142_p8 }
  0x1c   :  { %150 = shalt.err (!%p147_p10)
}
  0x1d   :  { %s151_s9 = scalar_lea.vmem %s32_s28, 16  ;;  %s155_s0 = scalar_lea.vmem %s32_s28, 32 }
  0x1e   :  { %p152_p11 = scmp.ne.s32.totalorder %s32_s28, %s151_s9  ;;  %p156_p12 = scmp.lt.s32.totalorder %s32_s28, %s32_s28 }
  0x1f   :  { %p157_p13 = scmp.lt.s32.totalorder %s155_s0, %s151_s9 }
  0x21   :  { %p158_p0 = por %p157_p13, %p156_p12 }
  0x23   :  { %p159_p1 = pnand %p158_p0, %p152_p11 }
  0x25   :  { %162 = shalt.err (!%p159_p1)
}
  0x26   :  { %34 = dma.hbm_to_vmem [thread:$0]  %s262_s1, 16, %s32_s28, [#allocation7]  }
  0x27   :  { %185 = dma.done.wait [#allocation4], 256  }
  0x28   :  { %186 = vsyncadd [#allocation4], 4294967040 }
  0x29   :  { %187 = dma.done.wait [#allocation7], 16  }
  0x2a   :  { %188 = vsyncadd [#allocation7], 4294967280  ;;  %v43_v1 = vld [vmem:[#allocation3] sm:$0xff]  ;;  %v102_v2 = vld [vmem:[#allocation6] ss:$0 sm:$0xff]  ;;  %vm81_vm0 = vcmask 7168  }
  0x2b   :  { %v44_v3 = vld [vmem:[#allocation3 + $0x8] sm:$0xff]  ;;  %v52_v4 = vmul.f32 %v102_v2, %v43_v1  ;;  %v103_v6 = vld [vmem:[#allocation2] ss:$0 sm:$0xff]  ;;  %s195_s1 = smov [#allocation8]  }
  0x2c   :  { %v53_v5 = vmul.f32 %v102_v2, %v44_v3  ;;  %s89_s12 = sshll.u32 %s195_s1, 4  ;;  %s90_s12 = int_to_ptr.vmem [resolvable:$true] %s89_s12 }
  0x2d   :  { %56 = vadd.xlane.f32.xlu0 %v52_v4  ;;  %s163_s13 = scalar_lea.vmem %s90_s12, 256  ;;  %p168_p3 = scmp.lt.s32.totalorder %s90_s12, %s90_s12 }
  0x2e   :  { %p164_p2 = scmp.ne.s32.totalorder %s90_s12, %s163_s13  ;;  %p169_p4 = scmp.lt.s32.totalorder %s163_s13, %s163_s13 }
  0x30   :  { %p170_p5 = por %p169_p4, %p168_p3 }
  0x31   :  { %58 = vadd.xlane.f32.xlu0 %v53_v5 }
  0x32   :  { %p171_p6 = pnand %p170_p5, %p164_p2 }
  0xba   :  { %v57_v7 = vpop.xlane.xlu0 %56 }
  0xbb   :  { %v67_v8 = vadd.f32 %v103_v6, %v57_v7 }
  0xbd   :  { %v104_v9 = vmul.f32 -1.442695, %v67_v8 }
  0xbe   :  { %v59_v10 = vpop.xlane.xlu0 %58 }
  0xbf   :  { %111 = vpow2.f32 %v104_v9  ;;  %v68_v11 = vadd.f32 %v103_v6, %v59_v10 }
  0xc1   :  { %v105_v12 = vmul.f32 -1.442695, %v68_v11 }
  0xc3   :  { %113 = vpow2.f32 %v105_v12 }
  0xc9   :  { %v112_v13 = vpop.eup %111 }
  0xca   :  { %v75_v14 = vadd.f32 1.0, %v112_v13 }
  0xcc   :  { %115 = vrcp.f32 %v75_v14 }
  0xcd   :  { %v114_v15 = vpop.eup %113 }
  0xce   :  { %v76_v16 = vadd.f32 1.0, %v114_v15 }
  0xd0   :  { %117 = vrcp.f32 %v76_v16 }
  0xd6   :  { %v116_v17 = vpop.eup %115 }
  0xd7   :  { %82 = vst.msk [vmem:[#allocation8] sm:$0xff] %vm81_vm0, %v116_v17 }
  0xda   :  { %v118_v18 = vpop.eup %117 }
  0xdb   :  { %83 = vst.msk [vmem:[#allocation8 + $0x8] sm:$0xff] %vm81_vm0, %v118_v18 }
  0xdc   :  { %174 = shalt.err (!%p171_p6)
}
  0xdd   :  { %s175_s16 = scalar_lea.hbm %s264_s3, 256 }
  0xde   :  { %p176_p7 = scmp.ne.s32.totalorder %s264_s3, %s175_s16  ;;  %p179_p8 = scmp.lt.u32.totalorder %s175_s16, %s264_s3 }
  0xe0   :  { %p181_p9 = pnand %p179_p8, %p176_p7 }
  0xe2   :  { %184 = shalt.err (!%p181_p9)
}
  0xe3   :  { %95 = dma.vmem_to_hbm [thread:$0]  %s90_s12, 256, %s264_s3, [#allocation5], %s192_s23, %s192_s23, %s193_s24  }
  0xe4   :  { %189 = dma.done.wait [#allocation5], 256  }
  0xe5   :  { %190 = vsyncadd [#allocation5], 4294967040 }
  0xe6   :  { %99 = vsyncpa [#allocation4], 1 }
  0xe7   :  { %100 = vsyncpa [#allocation7], 1 }
  0xe8   :  { %101 = vsyncpa [#allocation5], 1 }

</bundles_post_ra>
